<compile_context>
chip_gen: v6e
topology: v6e:2x2x1
jax: 0.10.0
libtpu: 0.0.40
codegen_flags: <defaults>
</compile_context>

<pallas_src>
import math

import jax
import jax.numpy as jnp
from jax.experimental import pallas as pl
from jax.experimental.pallas import tpu as pltpu

_LANE = 128


def _make_dice_kernel(n_valid, sb, grp, needs_mask):
    """Build the per-block partial-reduction kernel.

    Block inputs:  pred/target (B, sb, 128).
    Block outputs: inter/psum/tsum accumulators (1, B, grp, 128), resident in
    VMEM across the innermost ('arbitrary') reduction grid axis.
    """
    gsub = sb // grp

    def kernel(pred_ref, target_ref, inter_ref, psum_ref, tsum_ref):
        k = pl.program_id(1)

        @pl.when(k == 0)
        def _():
            inter_ref[...] = jnp.zeros_like(inter_ref)
            psum_ref[...] = jnp.zeros_like(psum_ref)
            tsum_ref[...] = jnp.zeros_like(tsum_ref)

        p = jax.nn.sigmoid(pred_ref[...].astype(jnp.float32))  # (B, sb, 128)
        t = target_ref[...].astype(jnp.float32)

        if needs_mask:
            # Ragged tail handled in-kernel (no wrapper pad pass): zero every
            # element whose flat per-row index >= n_valid. Covers the lane
            # tail of the last sublane, partial last blocks, and fully
            # out-of-range steps of an uneven split.
            base = (pl.program_id(0) * pl.num_programs(1) + k) * sb
            sub = jax.lax.broadcasted_iota(jnp.int32, p.shape, 1)
            lane = jax.lax.broadcasted_iota(jnp.int32, p.shape, 2)
            valid = (base + sub) * _LANE + lane < n_valid
            p = jnp.where(valid, p, 0.0)
            t = jnp.where(valid, t, 0.0)

        b = p.shape[0]
        # Group sublanes by vreg height (grp=8 when possible) so the axis=1
        # partial sums are pure VPU vreg adds; the final grp->1 and 128-lane
        # reductions happen in the tiny JAX epilogue (keeps per-step XLU work
        # out of the hot loop).
        p4 = p.reshape(b, gsub, grp, _LANE)
        t4 = t.reshape(b, gsub, grp, _LANE)

        inter_ref[...] += jnp.sum(p4 * t4, axis=1)[None]  # (1, B, grp, 128)
        psum_ref[...] += jnp.sum(p4, axis=1)[None]
        tsum_ref[...] += jnp.sum(t4, axis=1)[None]

    return kernel


def dice_loss(pred, target, smooth=1e-6, *, nsplit=1,
              target_block_bytes=4 * 1024 * 1024, core_parallel=False,
              min_kernel_elements=0):
    """Pallas DiceLoss.  pred/target: (B, ...) -> scalar float32 loss.

    nsplit:        number of independent reduction splits. Keep 1 on single-TC
                   parts (v5e/v6e); use 2 (+ core_parallel=True) on v7x.
    core_parallel: use CORE_PARALLEL semantics for the split axis (v7x only).
    min_kernel_elements: below this element count, fall back to plain JAX
                   (set to ~1e6 in production; 0 here so the kernel runs).
    """
    assert pred.shape == target.shape
    B = pred.shape[0]
    N = math.prod(pred.shape[1:]) if pred.ndim > 1 else 1

    if B * N < min_kernel_elements:
        return dice_loss_ref(pred, target, smooth)

    pred2 = pred.reshape(B, N)
    targ2 = target.reshape(B, N)

    isz_p = pred2.dtype.itemsize
    isz_t = targ2.dtype.itemsize
    # Dtype-aware sublane granule: 8 (f32), 16 (bf16), 32 (1-byte dtypes).
    gran = max(8, 8 * (4 // max(1, min(isz_p, isz_t))))

    S = pl.cdiv(N, _LANE)                 # sublanes per row at lane width 128
    lane_pad = S * _LANE - N
    if lane_pad > 0:
        # Minimal pad (< 128 elems/row) purely to reach lane width; the pad
        # value is irrelevant because of the in-kernel mask.
        pred2 = jnp.pad(pred2, ((0, 0), (0, lane_pad)))
        targ2 = jnp.pad(targ2, ((0, 0), (0, lane_pad)))

    pred3 = pred2.reshape(B, S, _LANE)
    targ3 = targ2.reshape(B, S, _LANE)

    # Sublanes per block: sized toward ~target_block_bytes per input block,
    # hard-capped so 2 inputs x 2 pipeline buffers stay <= ~24 MiB (safe on
    # every generation, incl. v7x's 64 MiB physical VMEM).
    per_sublane_bytes = B * _LANE * (isz_p + isz_t)
    sb_budget = max(
        gran,
        (target_block_bytes // (B * _LANE * max(isz_p, isz_t))) // gran * gran)
    sb_cap = max(gran, ((24 * 1024 * 1024) // (2 * per_sublane_bytes))
                 // gran * gran)
    sb_budget = min(sb_budget, sb_cap)

    if S <= sb_budget:
        sb = S                       # single block; full-dim block is legal
    else:
        sb = min(sb_budget, (S // gran) * gran)

    grp = 8 if sb % 8 == 0 else 1    # vreg-height grouping for the accumulator

    total_blocks = pl.cdiv(S, sb)
    steps = pl.cdiv(total_blocks, max(1, int(nsplit)))
    nsplit_eff = pl.cdiv(total_blocks, steps)

    needs_mask = (nsplit_eff * steps * sb * _LANE) != N

    if nsplit_eff > 1:
        # Clamp block index so an uneven split never requests a fully
        # out-of-range block; the mask zeroes its contribution anyway.
        def in_map(p, k):
            return (0, jnp.minimum(p * steps + k, total_blocks - 1), 0)
    else:
        def in_map(p, k):
            return (0, k, 0)

    def out_map(p, k):
        return (p, 0, 0, 0)

    part_shape = jax.ShapeDtypeStruct((nsplit_eff, B, grp, _LANE), jnp.float32)

    in_block_bytes = B * sb * _LANE * (isz_p + isz_t)
    out_block_bytes = 3 * B * grp * _LANE * 4
    vmem_limit = max(32 * 1024 * 1024,
                     2 * in_block_bytes + 2 * out_block_bytes + (4 << 20))

    if core_parallel and nsplit_eff > 1:
        dim_sems = (pltpu.CORE_PARALLEL, "arbitrary")
    else:
        dim_sems = ("parallel", "arbitrary")

    kernel = _make_dice_kernel(N, sb, grp, needs_mask)

    inter_p, psum_p, tsum_p = pl.pallas_call(
        kernel,
        out_shape=(part_shape, part_shape, part_shape),
        grid_spec=pltpu.PrefetchScalarGridSpec(
            num_scalar_prefetch=0,
            grid=(nsplit_eff, steps),
            in_specs=[
                pl.BlockSpec((B, sb, _LANE), in_map),
                pl.BlockSpec((B, sb, _LANE), in_map),
            ],
            out_specs=(
                pl.BlockSpec((1, B, grp, _LANE), out_map),
                pl.BlockSpec((1, B, grp, _LANE), out_map),
                pl.BlockSpec((1, B, grp, _LANE), out_map),
            ),
        ),
        compiler_params=pltpu.CompilerParams(
            dimension_semantics=dim_sems,
            vmem_limit_bytes=int(vmem_limit),
        ),
    )(pred3, targ3)

    # Tiny epilogue in plain JAX: combine splits + sublane group + lanes,
    # then dice & mean.
    inter = jnp.sum(inter_p, axis=(0, 2, 3))  # (B,)
    psum = jnp.sum(psum_p, axis=(0, 2, 3))
    tsum = jnp.sum(tsum_p, axis=(0, 2, 3))
    dice = (2.0 * inter + smooth) / (psum + tsum + smooth)
    return jnp.mean(1.0 - dice)


def dice_loss_ref(pred, target, smooth=1e-6):
    """Pure-JAX reference matching the PyTorch module."""
    B = pred.shape[0]
    p = jax.nn.sigmoid(pred).reshape(B, -1)
    t = target.reshape(B, -1)
    inter = jnp.sum(p * t, axis=1)
    dice = (2.0 * inter + smooth) / (
        jnp.sum(p, axis=1) + jnp.sum(t, axis=1) + smooth)
    return jnp.mean(1.0 - dice)


if __name__ == "__main__":
    key = jax.random.PRNGKey(0)
    k1, k2 = jax.random.split(key)

    # Case 1: nominal NCHW shape; N % 128 == 0, single block, no masking.
    B, C, H, W = 2, 4, 16, 16
    pred = jax.random.normal(k1, (B, C, H, W), dtype=jnp.float32)
    target = (jax.random.uniform(k2, (B, C, H, W)) > 0.5).astype(jnp.float32)
    loss = jax.block_until_ready(dice_loss(pred, target))
    ref = jax.block_until_ready(dice_loss_ref(pred, target))
    assert jnp.allclose(loss, ref, rtol=1e-5, atol=1e-5), (loss, ref)

    # Case 2: N not a multiple of 128 -> minimal lane pad + in-kernel mask.
    k3, k4 = jax.random.split(k1)
    pred2 = jax.random.normal(k3, (2, 3, 20, 11), dtype=jnp.float32)
    target2 = (jax.random.uniform(k4, (2, 3, 20, 11)) > 0.5).astype(jnp.float32)
    loss2 = jax.block_until_ready(dice_loss(pred2, target2))
    ref2 = jax.block_until_ready(dice_loss_ref(pred2, target2))
    assert jnp.allclose(loss2, ref2, rtol=1e-5, atol=1e-5), (loss2, ref2)

    # Case 3: multi-step accumulation, partial last block and a 2-way split
    # (exercises the clamp + mask path) via a deliberately tiny block size.
    k5, k6 = jax.random.split(k2)
    pred3 = jax.random.normal(k5, (2, 4, 40, 16), dtype=jnp.float32)
    target3 = (jax.random.uniform(k6, (2, 4, 40, 16)) > 0.5).astype(jnp.float32)
    loss3 = jax.block_until_ready(
        dice_loss(pred3, target3, nsplit=2, target_block_bytes=8 * 1024))
    ref3 = jax.block_until_ready(dice_loss_ref(pred3, target3))
    assert jnp.allclose(loss3, ref3, rtol=1e-5, atol=1e-5), (loss3, ref3)

    print("KERNEL_OK")
</pallas_src>

<mosaic_0001>
module attributes {stable_mosaic.version = 11 : i64} {
  func.func @kernel(%arg0: i32, %arg1: i32, %arg2: memref<2x8x128xf32, #tpu.memory_space<vmem>>, %arg3: memref<2x8x128xf32, #tpu.memory_space<vmem>>, %arg4: memref<1x2x8x128xf32, #tpu.memory_space<vmem>>, %arg5: memref<1x2x8x128xf32, #tpu.memory_space<vmem>>, %arg6: memref<1x2x8x128xf32, #tpu.memory_space<vmem>>) attributes {dimension_semantics = [#tpu.dimension_semantics<parallel>, #tpu.dimension_semantics<arbitrary>], iteration_bounds = array<i64: 1, 1>, scalar_prefetch = 0 : i64, scratch_operands = 0 : i64, tpu.core_type = #tpu.core_type<tc>, window_params = [{transform_indices = @transform_0, window_bounds = array<i64: 2, 8, 128>}, {transform_indices = @transform_1, window_bounds = array<i64: 2, 8, 128>}, {transform_indices = @transform_2, window_bounds = array<i64: 1, 2, 8, 128>}, {transform_indices = @transform_3, window_bounds = array<i64: 1, 2, 8, 128>}, {transform_indices = @transform_4, window_bounds = array<i64: 1, 2, 8, 128>}]} {
    %c0_i32 = arith.constant 0 : i32
    %0 = arith.cmpi eq, %arg1, %c0_i32 : i32
    %1 = arith.extui %0 : i1 to i32
    %c0_i32_0 = arith.constant 0 : i32
    %2 = arith.cmpi ne, %1, %c0_i32_0 : i32
    scf.if %2 {
      %cst_33 = arith.constant 0.000000e+00 : f32
      %28 = vector.broadcast %cst_33 : f32 to vector<1x2x8x128xf32>
      %c0_34 = arith.constant 0 : index
      %c0_35 = arith.constant 0 : index
      %c0_36 = arith.constant 0 : index
      %c0_37 = arith.constant 0 : index
      %29 = vector.load %arg4[%c0_34, %c0_35, %c0_36, %c0_37] : memref<1x2x8x128xf32, #tpu.memory_space<vmem>>, vector<1x2x8x128xf32>
      tpu.vector_store %arg4[%c0_34, %c0_35, %c0_36, %c0_37], %28 {strides = array<i32>} : memref<1x2x8x128xf32, #tpu.memory_space<vmem>>, vector<1x2x8x128xf32>,
      %cst_38 = arith.constant 0.000000e+00 : f32
      %30 = vector.broadcast %cst_38 : f32 to vector<1x2x8x128xf32>
      %c0_39 = arith.constant 0 : index
      %c0_40 = arith.constant 0 : index
      %c0_41 = arith.constant 0 : index
      %c0_42 = arith.constant 0 : index
      %31 = vector.load %arg5[%c0_39, %c0_40, %c0_41, %c0_42] : memref<1x2x8x128xf32, #tpu.memory_space<vmem>>, vector<1x2x8x128xf32>
      tpu.vector_store %arg5[%c0_39, %c0_40, %c0_41, %c0_42], %30 {strides = array<i32>} : memref<1x2x8x128xf32, #tpu.memory_space<vmem>>, vector<1x2x8x128xf32>,
      %cst_43 = arith.constant 0.000000e+00 : f32
      %32 = vector.broadcast %cst_43 : f32 to vector<1x2x8x128xf32>
      %c0_44 = arith.constant 0 : index
      %c0_45 = arith.constant 0 : index
      %c0_46 = arith.constant 0 : index
      %c0_47 = arith.constant 0 : index
      %33 = vector.load %arg6[%c0_44, %c0_45, %c0_46, %c0_47] : memref<1x2x8x128xf32, #tpu.memory_space<vmem>>, vector<1x2x8x128xf32>
      tpu.vector_store %arg6[%c0_44, %c0_45, %c0_46, %c0_47], %32 {strides = array<i32>} : memref<1x2x8x128xf32, #tpu.memory_space<vmem>>, vector<1x2x8x128xf32>,
    } else {
    }
    %c0 = arith.constant 0 : index
    %c0_1 = arith.constant 0 : index
    %c0_2 = arith.constant 0 : index
    %3 = vector.load %arg2[%c0, %c0_1, %c0_2] : memref<2x8x128xf32, #tpu.memory_space<vmem>>, vector<2x8x128xf32>
    %4 = arith.negf %3 : vector<2x8x128xf32>
    %5 = math.exp %4 : vector<2x8x128xf32>
    %cst = arith.constant 1.000000e+00 : f32
    %6 = vector.broadcast %cst : f32 to vector<2x8x128xf32>
    %7 = arith.addf %6, %5 : vector<2x8x128xf32>
    %8 = arith.divf %6, %7 : vector<2x8x128xf32>
    %c0_3 = arith.constant 0 : index
    %c0_4 = arith.constant 0 : index
    %c0_5 = arith.constant 0 : index
    %9 = vector.load %arg3[%c0_3, %c0_4, %c0_5] : memref<2x8x128xf32, #tpu.memory_space<vmem>>, vector<2x8x128xf32>
    %10 = vector.shape_cast %8 : vector<2x8x128xf32> to vector<2x1x8x128xf32>
    %11 = vector.shape_cast %9 : vector<2x8x128xf32> to vector<2x1x8x128xf32>
    %c0_6 = arith.constant 0 : index
    %c0_7 = arith.constant 0 : index
    %c0_8 = arith.constant 0 : index
    %c0_9 = arith.constant 0 : index
    %12 = vector.load %arg4[%c0_6, %c0_7, %c0_8, %c0_9] : memref<1x2x8x128xf32, #tpu.memory_space<vmem>>, vector<1x2x8x128xf32>
    %13 = arith.mulf %10, %11 : vector<2x1x8x128xf32>
    %cst_10 = arith.constant dense<0.000000e+00> : vector<2x8x128xf32>
    %14 = vector.multi_reduction <add>, %13, %cst_10 [1] : vector<2x1x8x128xf32> to vector<2x8x128xf32>
    %15 = vector.shape_cast %14 : vector<2x8x128xf32> to vector<1x2x8x128xf32>
    %16 = arith.addf %12, %15 : vector<1x2x8x128xf32>
    %c0_11 = arith.constant 0 : index
    %c0_12 = arith.constant 0 : index
    %c0_13 = arith.constant 0 : index
    %c0_14 = arith.constant 0 : index
    %17 = vector.load %arg4[%c0_11, %c0_12, %c0_13, %c0_14] : memref<1x2x8x128xf32, #tpu.memory_space<vmem>>, vector<1x2x8x128xf32>
    tpu.vector_store %arg4[%c0_11, %c0_12, %c0_13, %c0_14], %16 {strides = array<i32>} : memref<1x2x8x128xf32, #tpu.memory_space<vmem>>, vector<1x2x8x128xf32>,
    %c0_15 = arith.constant 0 : index
    %c0_16 = arith.constant 0 : index
    %c0_17 = arith.constant 0 : index
    %c0_18 = arith.constant 0 : index
    %18 = vector.load %arg5[%c0_15, %c0_16, %c0_17, %c0_18] : memref<1x2x8x128xf32, #tpu.memory_space<vmem>>, vector<1x2x8x128xf32>
    %cst_19 = arith.constant dense<0.000000e+00> : vector<2x8x128xf32>
    %19 = vector.multi_reduction <add>, %10, %cst_19 [1] : vector<2x1x8x128xf32> to vector<2x8x128xf32>
    %20 = vector.shape_cast %19 : vector<2x8x128xf32> to vector<1x2x8x128xf32>
    %21 = arith.addf %18, %20 : vector<1x2x8x128xf32>
    %c0_20 = arith.constant 0 : index
    %c0_21 = arith.constant 0 : index
    %c0_22 = arith.constant 0 : index
    %c0_23 = arith.constant 0 : index
    %22 = vector.load %arg5[%c0_20, %c0_21, %c0_22, %c0_23] : memref<1x2x8x128xf32, #tpu.memory_space<vmem>>, vector<1x2x8x128xf32>
    tpu.vector_store %arg5[%c0_20, %c0_21, %c0_22, %c0_23], %21 {strides = array<i32>} : memref<1x2x8x128xf32, #tpu.memory_space<vmem>>, vector<1x2x8x128xf32>,
    %c0_24 = arith.constant 0 : index
    %c0_25 = arith.constant 0 : index
    %c0_26 = arith.constant 0 : index
    %c0_27 = arith.constant 0 : index
    %23 = vector.load %arg6[%c0_24, %c0_25, %c0_26, %c0_27] : memref<1x2x8x128xf32, #tpu.memory_space<vmem>>, vector<1x2x8x128xf32>
    %cst_28 = arith.constant dense<0.000000e+00> : vector<2x8x128xf32>
    %24 = vector.multi_reduction <add>, %11, %cst_28 [1] : vector<2x1x8x128xf32> to vector<2x8x128xf32>
    %25 = vector.shape_cast %24 : vector<2x8x128xf32> to vector<1x2x8x128xf32>
    %26 = arith.addf %23, %25 : vector<1x2x8x128xf32>
    %c0_29 = arith.constant 0 : index
    %c0_30 = arith.constant 0 : index
    %c0_31 = arith.constant 0 : index
    %c0_32 = arith.constant 0 : index
    %27 = vector.load %arg6[%c0_29, %c0_30, %c0_31, %c0_32] : memref<1x2x8x128xf32, #tpu.memory_space<vmem>>, vector<1x2x8x128xf32>
    tpu.vector_store %arg6[%c0_29, %c0_30, %c0_31, %c0_32], %26 {strides = array<i32>} : memref<1x2x8x128xf32, #tpu.memory_space<vmem>>, vector<1x2x8x128xf32>,
    return
  }
  func.func @transform_0(%arg0: i32, %arg1: i32) -> (i32, i32, i32) {
    %c0_i32 = arith.constant 0 : i32
    %c0_i32_0 = arith.constant 0 : i32
    %c0_i32_1 = arith.constant 0 : i32
    return %c0_i32, %arg1, %c0_i32_0 : i32, i32, i32
  }
  func.func @transform_1(%arg0: i32, %arg1: i32) -> (i32, i32, i32) {
    %c0_i32 = arith.constant 0 : i32
    %c0_i32_0 = arith.constant 0 : i32
    %c0_i32_1 = arith.constant 0 : i32
    return %c0_i32, %arg1, %c0_i32_0 : i32, i32, i32
  }
  func.func @transform_2(%arg0: i32, %arg1: i32) -> (i32, i32, i32, i32) {
    %c0_i32 = arith.constant 0 : i32
    %c0_i32_0 = arith.constant 0 : i32
    %c0_i32_1 = arith.constant 0 : i32
    %c0_i32_2 = arith.constant 0 : i32
    return %arg0, %c0_i32, %c0_i32_0, %c0_i32_1 : i32, i32, i32, i32
  }
  func.func @transform_3(%arg0: i32, %arg1: i32) -> (i32, i32, i32, i32) {
    %c0_i32 = arith.constant 0 : i32
    %c0_i32_0 = arith.constant 0 : i32
    %c0_i32_1 = arith.constant 0 : i32
    %c0_i32_2 = arith.constant 0 : i32
    return %arg0, %c0_i32, %c0_i32_0, %c0_i32_1 : i32, i32, i32, i32
  }
  func.func @transform_4(%arg0: i32, %arg1: i32) -> (i32, i32, i32, i32) {
    %c0_i32 = arith.constant 0 : i32
    %c0_i32_0 = arith.constant 0 : i32
    %c0_i32_1 = arith.constant 0 : i32
    %c0_i32_2 = arith.constant 0 : i32
    return %arg0, %c0_i32, %c0_i32_0, %c0_i32_1 : i32, i32, i32, i32
  }
}

</mosaic_0001>

<bundles_post_ra>
// kernel: tpu_custom_call.1
= control target key start
LH: loop header
LB: loop body
LE: loop exit
PB: predicated region body
PF: predicated region fallthrough
CT: control target
= control target key end

     0   :  { %10 = vsyncpa [#allocation3], 0  ;;  %s340_s0 = inlined_call_operand.hbm [shape: f32[2,8,128], index: 0, kind: input, shape index: {}]   ;;  %s341_s1 = inlined_call_operand.hbm [shape: f32[2,8,128], index: 1, kind: input, shape index: {}]   ;;  %s342_s2 = inlined_call_operand.hbm [shape: f32[1,2,8,128], index: 2, kind: output, shape index: {0}]   ;;  %s343_s3 = inlined_call_operand.hbm [shape: f32[1,2,8,128], index: 3, kind: output, shape index: {1}]   ;;  %s344_s4 = inlined_call_operand.hbm [shape: f32[1,2,8,128], index: 4, kind: output, shape index: {2}]  }
   0x1   :  { %11 = vsyncpa [#allocation6], 0 }
   0x2   :  { %12 = vsyncpa [#allocation4], 0 }
   0x3   :  { %13 = vsyncpa [#allocation9], 0  ;;  %s271_s15 = smov [#allocation2]  }
   0x4   :  { %s19_s16 = sshll.u32 %s271_s15, 4  ;;  %s20_s16 = int_to_ptr.vmem [resolvable:$true] %s19_s16 }
   0x5   :  { %s171_s17 = scalar_lea.vmem %s20_s16, 256  ;;  %p176_p1 = scmp.lt.s32.totalorder %s20_s16, %s20_s16 }
   0x6   :  { %p172_p0 = scmp.ne.s32.totalorder %s20_s16, %s171_s17  ;;  %p177_p2 = scmp.lt.s32.totalorder %s171_s17, %s171_s17 }
   0x8   :  { %p178_p3 = por %p177_p2, %p176_p1 }
   0xa   :  { %p179_p4 = pnand %p178_p3, %p172_p0 }
   0xc   :  { %182 = shalt.err (!%p179_p4)
}
   0xd   :  { %s272_s18 = smov 128   ;;  %s273_s19 = smov 8  }
   0xe   :  { %25 = dma.hbm_to_vmem [thread:$0]  %s340_s0, 256, %s20_s16, [#allocation3], %s272_s18, %s272_s18, %s273_s19  }
   0xf   :  { %s274_s22 = smov [#allocation5]  }
  0x10   :  { %s31_s23 = sshll.u32 %s274_s22, 4  ;;  %s32_s23 = int_to_ptr.vmem [resolvable:$true] %s31_s23 }
  0x11   :  { %s191_s24 = scalar_lea.vmem %s32_s23, 256  ;;  %p196_p6 = scmp.lt.s32.totalorder %s32_s23, %s32_s23 }
  0x12   :  { %p192_p5 = scmp.ne.s32.totalorder %s32_s23, %s191_s24  ;;  %p197_p7 = scmp.lt.s32.totalorder %s191_s24, %s191_s24 }
  0x14   :  { %p198_p8 = por %p197_p7, %p196_p6 }
  0x16   :  { %p199_p9 = pnand %p198_p8, %p192_p5 }
  0x18   :  { %202 = shalt.err (!%p199_p9)
}
  0x19   :  { %37 = dma.hbm_to_vmem [thread:$0]  %s341_s1, 256, %s32_s23, [#allocation6], %s272_s18, %s272_s18, %s273_s19  }
  0x1a   :  { %263 = dma.done.wait [#allocation3], 256  }
  0x1b   :  { %264 = vsyncadd [#allocation3], 4294967040 }
  0x1c   :  { %265 = dma.done.wait [#allocation6], 256  }
  0x1d   :  { %266 = vsyncadd [#allocation6], 4294967040  ;;  %v54_v0 = vld [vmem:[#allocation2] sm:$0xff]  ;;  %v55_v1 = vld [vmem:[#allocation2 + $0x8] sm:$0xff]  ;;  %s275_s0 = smov [#allocation8]   ;;  %s276_s27 = smov [#allocation10]  }
  0x1e   :  { %v68_v2 = vld [vmem:[#allocation5] sm:$0xff]  ;;  %v145_v3 = vmul.f32 -1.442695, %v54_v0  ;;  %v146_v4 = vmul.f32 -1.442695, %v55_v1  ;;  %v69_v5 = vld [vmem:[#allocation5 + $0x8] sm:$0xff] }
  0x1f   :  { %94 = vst [vmem:[#allocation10] sm:$0xff] %v68_v2  ;;  %95 = vst [vmem:[#allocation10 + $0x8] sm:$0xff] %v69_v5  ;;  %s113_s1 = sshll.u32 %s275_s0, 4  ;;  %s125_s28 = sshll.u32 %s276_s27, 4  ;;  %s114_s1 = int_to_ptr.vmem [resolvable:$true] %s113_s1  ;;  %s126_s28 = int_to_ptr.vmem [resolvable:$true] %s125_s28 }
  0x20   :  { %155 = vpow2.f32 %v145_v3  ;;  %s277_s29 = smov [#allocation7]   ;;  %s203_s5 = scalar_lea.vmem %s114_s1, 256 }
  0x21   :  { %157 = vpow2.f32 %v146_v4  ;;  %s101_s30 = sshll.u32 %s277_s29, 4  ;;  %p204_p10 = scmp.ne.s32.totalorder %s114_s1, %s203_s5  ;;  %s315_s30 = int_to_ptr.vmem [resolvable:$true] %s101_s30 }
  0x22   :  { %p208_p11 = scmp.lt.s32.totalorder %s114_s1, %s114_s1  ;;  %p209_p12 = scmp.lt.s32.totalorder %s203_s5, %s203_s5 }
  0x24   :  { %p210_p13 = por %p209_p12, %p208_p11 }
  0x26   :  { %p211_p0 = pnand %p210_p13, %p204_p10 }
  0x2d   :  { %v156_v6 = vpop.eup %155 }
  0x2e   :  { %v158_v7 = vpop.eup %157  ;;  %v62_v8 = vadd.f32 1.0, %v156_v6 }
  0x2f   :  { %v63_v9 = vadd.f32 1.0, %v158_v7 }
  0x30   :  { %159 = vrcp.f32 %v62_v8 }
  0x31   :  { %161 = vrcp.f32 %v63_v9 }
  0x3d   :  { %v160_v10 = vpop.eup %159 }
  0x3e   :  { %v162_v11 = vpop.eup %161  ;;  %v72_v12 = vmul.f32 %v160_v10, %v68_v2  ;;  %86 = vst [vmem:[#allocation8] sm:$0xff] %v160_v10 }
  0x3f   :  { %v73_v13 = vmul.f32 %v162_v11, %v69_v5  ;;  %87 = vst [vmem:[#allocation8 + $0x8] sm:$0xff] %v162_v11 }
  0x40   :  { %78 = vst [vmem:[#allocation7] sm:$0xff] %v72_v12 }
  0x41   :  { %214 = shalt.err (!%p211_p0)
}
  0x42   :  { %119 = dma.vmem_to_hbm [thread:$0]  %s114_s1, 256, %s343_s3, [#allocation9], %s272_s18, %s272_s18, %s273_s19   ;;  %79 = vst [vmem:[#allocation7 + $0x8] sm:$0xff] %v73_v13 }
  0x43   :  { %s223_s8 = scalar_lea.vmem %s126_s28, 256  ;;  %p228_p2 = scmp.lt.s32.totalorder %s126_s28, %s126_s28 }
  0x44   :  { %p224_p1 = scmp.ne.s32.totalorder %s126_s28, %s223_s8  ;;  %p229_p3 = scmp.lt.s32.totalorder %s223_s8, %s223_s8 }
  0x46   :  { %p230_p4 = por %p229_p3, %p228_p2 }
  0x48   :  { %p231_p5 = pnand %p230_p4, %p224_p1 }
  0x4a   :  { %234 = shalt.err (!%p231_p5)
}
  0x4b   :  { %131 = dma.vmem_to_hbm [thread:$0]  %s126_s28, 256, %s344_s4, [#allocation9], %s272_s18, %s272_s18, %s273_s19  }
  0x4c   :  { %s243_s11 = scalar_lea.vmem %s315_s30, 256  ;;  %p248_p7 = scmp.lt.s32.totalorder %s315_s30, %s315_s30 }
  0x4d   :  { %p244_p6 = scmp.ne.s32.totalorder %s315_s30, %s243_s11  ;;  %p249_p8 = scmp.lt.s32.totalorder %s243_s11, %s243_s11 }
  0x4f   :  { %p250_p9 = por %p249_p8, %p248_p7 }
  0x51   :  { %p251_p10 = pnand %p250_p9, %p244_p6 }
  0x53   :  { %254 = shalt.err (!%p251_p10)
}
  0x54   :  { %107 = dma.vmem_to_hbm [thread:$0]  %s315_s30, 256, %s342_s2, [#allocation4], %s272_s18, %s272_s18, %s273_s19  }
  0x55   :  { %267 = dma.done.wait [#allocation4], 256  }
  0x56   :  { %268 = vsyncadd [#allocation4], 4294967040 }
  0x57   :  { %269 = dma.done.wait [#allocation9], 512  }
  0x58   :  { %270 = vsyncadd [#allocation9], 4294966784 }
  0x59   :  { %141 = vsyncpa [#allocation3], 1 }
  0x5a   :  { %142 = vsyncpa [#allocation6], 1 }
  0x5b   :  { %143 = vsyncpa [#allocation4], 1 }
  0x5c   :  { %144 = vsyncpa [#allocation9], 1 }

</bundles_post_ra>
